<compile_context>
chip_gen: v5e
topology: v5e:2x2
jax: 0.10.0
libtpu: 0.0.40
codegen_flags: <defaults>
</compile_context>

<pallas_src>
import jax
import jax.numpy as jnp
from jax.experimental import pallas as pl
from jax.experimental.pallas import tpu as pltpu


def _rmsnorm_kernel(x_ref, o_ref):
    # x_ref / o_ref: (block_rows, hidden) tiles in VMEM.
    x = x_ref[...].astype(jnp.float32)
    ms = jnp.mean(x * x, axis=-1, keepdims=True)   # mean of squares per row
    inv = jax.lax.rsqrt(ms)                        # 1 / sqrt(ms); exact rsqrt
    o_ref[...] = (x * inv).astype(o_ref.dtype)     # torch: X / rms.unsqueeze(-1)


def _pick_block_rows(rows, hidden, itemsize):
    """Largest row tile (sublane-packed for dtype) targeting ~4 MiB blocks."""
    pack = max(8, 32 // itemsize)            # f32 -> 8, bf16 -> 16, int8/fp8 -> 32
    target_bytes = 4 << 20                   # ~4 MiB per input block
    br = (target_bytes // max(1, hidden * itemsize)) // pack * pack
    br = max(pack, min(br, 8192))            # keep the grid reasonably long
    rows_up = ((rows + pack - 1) // pack) * pack
    return min(br, rows_up)                  # don't exceed (rounded-up) rows


def rmsnorm(x, block_rows=None):
    """RMS-normalize over the last axis of x (any leading dims)."""
    orig_shape = x.shape
    hidden = orig_shape[-1]
    x2d = x.reshape(-1, hidden)
    rows = x2d.shape[0]
    itemsize = jnp.dtype(x.dtype).itemsize

    if block_rows is None:
        block_rows = _pick_block_rows(rows, hidden, itemsize)

    grid = (pl.cdiv(rows, block_rows),)      # ragged last block: writes masked

    block_bytes = block_rows * hidden * itemsize
    # input + output, double-buffered, plus slack; at least the 32 MiB default.
    vmem_limit = max(32 << 20, 4 * block_bytes + (1 << 20))

    cost = pl.CostEstimate(
        flops=3 * rows * hidden,
        transcendentals=rows,
        bytes_accessed=2 * rows * hidden * itemsize,
    )

    out2d = pl.pallas_call(
        _rmsnorm_kernel,
        out_shape=jax.ShapeDtypeStruct((rows, hidden), x.dtype),
        grid_spec=pltpu.PrefetchScalarGridSpec(
            num_scalar_prefetch=0,
            grid=grid,
            in_specs=[pl.BlockSpec((block_rows, hidden), lambda i: (i, 0))],
            out_specs=pl.BlockSpec((block_rows, hidden), lambda i: (i, 0)),
        ),
        compiler_params=pltpu.CompilerParams(
            dimension_semantics=("parallel",),
            vmem_limit_bytes=int(vmem_limit),
        ),
        cost_estimate=cost,
    )(x2d)

    return out2d.reshape(orig_shape)


def _ref_rmsnorm(x):
    rms = jnp.sqrt(jnp.mean(x * x, axis=-1, keepdims=True))
    return x / rms


if __name__ == "__main__":
    key = jax.random.PRNGKey(0)

    # Small shape consistent with a generic last-axis RMSNorm: (batch, seq, hidden)
    x = jax.random.normal(key, (2, 8, 32), dtype=jnp.float32)
    out = rmsnorm(x)
    jax.block_until_ready(out)
    assert out.shape == x.shape
    assert jnp.allclose(out, _ref_rmsnorm(x), atol=1e-5, rtol=1e-5)

    # Second check: hidden multiple of 128, rows not a multiple of block_rows,
    # exercising the ragged (masked) last grid block with a multi-step grid.
    x2 = jax.random.normal(jax.random.PRNGKey(1), (3, 5, 128), dtype=jnp.float32)
    out2 = rmsnorm(x2, block_rows=8)   # rows=15 -> grid=2, last block ragged
    jax.block_until_ready(out2)
    assert out2.shape == x2.shape
    assert jnp.allclose(out2, _ref_rmsnorm(x2), atol=1e-5, rtol=1e-5)

    print("KERNEL_OK")
</pallas_src>

<mosaic_0001>
module attributes {stable_mosaic.version = 11 : i64} {
  func.func @_rmsnorm_kernel(%arg0: i32, %arg1: memref<16x32xf32, #tpu.memory_space<vmem>>, %arg2: memref<16x32xf32, #tpu.memory_space<vmem>>) attributes {dimension_semantics = [#tpu.dimension_semantics<parallel>], iteration_bounds = array<i64: 1>, scalar_prefetch = 0 : i64, scratch_operands = 0 : i64, tpu.core_type = #tpu.core_type<tc>, window_params = [{transform_indices = @transform_0, window_bounds = array<i64: 16, 32>}, {transform_indices = @transform_1, window_bounds = array<i64: 16, 32>}]} {
    %c0 = arith.constant 0 : index
    %c0_0 = arith.constant 0 : index
    %0 = vector.load %arg1[%c0, %c0_0] : memref<16x32xf32, #tpu.memory_space<vmem>>, vector<16x32xf32>
    %1 = arith.mulf %0, %0 : vector<16x32xf32>
    %cst = arith.constant dense<0.000000e+00> : vector<16xf32>
    %2 = vector.multi_reduction <add>, %1, %cst [1] : vector<16x32xf32> to vector<16xf32>
    %3 = vector.shape_cast %2 : vector<16xf32> to vector<16x1xf32>
    %cst_1 = arith.constant 3.200000e+01 : f32
    %4 = vector.broadcast %cst_1 : f32 to vector<16x1xf32>
    %5 = arith.divf %3, %4 : vector<16x1xf32>
    %6 = math.rsqrt %5 : vector<16x1xf32>
    %7 = vector.broadcast %6 : vector<16x1xf32> to vector<16x32xf32>
    %8 = arith.mulf %0, %7 : vector<16x32xf32>
    %c0_2 = arith.constant 0 : index
    %c0_3 = arith.constant 0 : index
    %9 = vector.load %arg2[%c0_2, %c0_3] : memref<16x32xf32, #tpu.memory_space<vmem>>, vector<16x32xf32>
    tpu.vector_store %arg2[%c0_2, %c0_3], %8 {strides = array<i32>} : memref<16x32xf32, #tpu.memory_space<vmem>>, vector<16x32xf32>,
    return
  }
  func.func @transform_0(%arg0: i32) -> (i32, i32) {
    %c0_i32 = arith.constant 0 : i32
    %c0_i32_0 = arith.constant 0 : i32
    return %arg0, %c0_i32 : i32, i32
  }
  func.func @transform_1(%arg0: i32) -> (i32, i32) {
    %c0_i32 = arith.constant 0 : i32
    %c0_i32_0 = arith.constant 0 : i32
    return %arg0, %c0_i32 : i32, i32
  }
}

</mosaic_0001>

<bundles_post_ra>
// kernel: tpu_custom_call.1
= control target key start
LH: loop header
LB: loop body
LE: loop exit
PB: predicated region body
PF: predicated region fallthrough
CT: control target
= control target key end

     0   :  { %6 = vsyncpa [#allocation3], 0  ;;  %s182_s0 = inlined_call_operand.hbm [shape: f32[16,32], index: 0, kind: input, shape index: {}]   ;;  %s183_s1 = inlined_call_operand.hbm [shape: f32[16,32], index: 1, kind: output, shape index: {}]  }
   0x1   :  { %7 = vsyncpa [#allocation4], 0  ;;  %s12_s8 = sshll.u32 %s182_s0, 4  ;;  %s151_s9 = smov [#allocation2]   ;;  %s13_s8 = int_to_ptr.hbm [resolvable:$true] %s12_s8 }
   0x2   :  { %s14_s10 = sshll.u32 %s151_s9, 4  ;;  %s152_s11 = smov 128   ;;  %s15_s10 = int_to_ptr.vmem [resolvable:$true] %s14_s10 }
   0x3   :  { %s153_s12 = smov 8  }
   0x4   :  { %20 = dma.hbm_to_vmem [thread:$0]  %s13_s8, 256, %s15_s10, [#allocation3], %s152_s11, %s152_s11, %s153_s12  }
   0x5   :  { %147 = dma.done.wait [#allocation3], 256  }
   0x6   :  { %148 = vsyncadd [#allocation3], 4294967040  ;;  %v25_v0 = vld [vmem:[#allocation2] sm:$0xff]  ;;  %vm29_vm0 = vcmask 261120   ;;  %v26_v2 = vld [vmem:[#allocation2 + $0x8] sm:$0xff]  ;;  %v154_v6 = vmov 32.0  }
   0x7   :  { %v27_v1 = vmul.f32 %v25_v0, %v25_v0  ;;  %v28_v4 = vmul.f32 %v26_v2, %v26_v2  ;;  %93 = vrcp.f32 %v154_v6  ;;  %s155_s0 = smov [#allocation5]   ;;  %s75_s16 = sshll.u32 %s183_s1, 4  ;;  %s76_s16 = int_to_ptr.hbm [resolvable:$true] %s75_s16 }
   0x8   :  { %s73_s13 = sshll.u32 %s155_s0, 4  ;;  %s74_s13 = int_to_ptr.vmem [resolvable:$true] %s73_s13 }
   0x9   :  { %v30_v3 = vsel %vm29_vm0, %v27_v1, 0.0  ;;  %v33_v5 = vsel %vm29_vm0, %v28_v4, 0.0 }
   0xa   :  { %31 = vadd.xlane.f32.xlu0 %v30_v3 }
   0xd   :  { %v94_v7 = vpop.eup %93 }
   0xe   :  { %v37_v8 = vmul.f32 32.0, %v94_v7  ;;  %vm41_vm1 = vweird.f32 %v94_v7 }
  0x10   :  { %v38_v9 = vsub.f32 1.0, %v37_v8 }
  0x12   :  { %34 = vadd.xlane.f32.xlu0 %v33_v5  ;;  %v39_v10 = vmul.f32 %v94_v7, %v38_v9 }
  0x14   :  { %v40_v11 = vadd.f32 %v94_v7, %v39_v10 }
  0x16   :  { %v42_v12 = vsel %vm41_vm1, %v94_v7, %v40_v11 }
  0x7d   :  { %v32_v13 = vpop.xlane.xlu0 %31 }
  0x7e   :  { %v43_v14 = vmul.f32 %v42_v12, %v32_v13 }
  0x80   :  { %95 = vrsqrt.f32 %v43_v14  ;;  %vm51_vm3 = vweird.f32 %v43_v14 }
  0x85   :  { %v35_v15 = vpop.xlane.xlu0 %34 }
  0x86   :  { %v96_v16 = vpop.eup %95  ;;  %v44_v17 = vmul.f32 %v42_v12, %v35_v15 }
  0x87   :  { %v46_v18 = vmul.f32 %v96_v16, %v43_v14  ;;  %vm52_vm2 = vweird.f32 %v96_v16 }
  0x88   :  { %97 = vrsqrt.f32 %v44_v17  ;;  %vm53_vm4 = vmor %vm51_vm3, %vm52_vm2  ;;  %vm61_vm6 = vweird.f32 %v44_v17 }
  0x89   :  { %v47_v19 = vmul.f32 %v96_v16, %v46_v18 }
  0x8b   :  { %v48_v20 = vmul.f32 0.5, %v47_v19 }
  0x8d   :  { %v49_v21 = vsub.f32 1.5, %v48_v20 }
  0x8e   :  { %v98_v22 = vpop.eup %97 }
  0x8f   :  { %v50_v23 = vmul.f32 %v96_v16, %v49_v21  ;;  %v56_v24 = vmul.f32 %v98_v22, %v44_v17  ;;  %vm62_vm5 = vweird.f32 %v98_v22 }
  0x90   :  { %vm63_vm7 = vmor %vm61_vm6, %vm62_vm5 }
  0x91   :  { %v54_v25 = vsel %vm53_vm4, %v96_v16, %v50_v23  ;;  %v57_v26 = vmul.f32 %v98_v22, %v56_v24 }
  0x92   :  { %v65_v27 = vmul.f32 %v54_v25, %v25_v0 }
  0x93   :  { %v58_v28 = vmul.f32 0.5, %v57_v26 }
  0x94   :  { %67 = vst.msk [vmem:[#allocation5] sm:$0xff] %vm29_vm0, %v65_v27 }
  0x95   :  { %v59_v29 = vsub.f32 1.5, %v58_v28 }
  0x97   :  { %v60_v30 = vmul.f32 %v98_v22, %v59_v29 }
  0x99   :  { %v64_v31 = vsel %vm63_vm7, %v98_v22, %v60_v30 }
  0x9a   :  { %v66_v32 = vmul.f32 %v64_v31, %v26_v2 }
  0x9c   :  { %68 = vst.msk [vmem:[#allocation5 + $0x8] sm:$0xff] %vm29_vm0, %v66_v32 }
  0x9d   :  { %81 = dma.vmem_to_hbm [thread:$0]  %s74_s13, 256, %s76_s16, [#allocation4], %s152_s11, %s152_s11, %s153_s12  }
  0x9e   :  { %149 = dma.done.wait [#allocation4], 256  }
  0x9f   :  { %150 = vsyncadd [#allocation4], 4294967040 }
  0xa0   :  { %86 = vsyncpa [#allocation3], 1 }
  0xa1   :  { %87 = vsyncpa [#allocation4], 1 }

</bundles_post_ra>
